<compile_context>
chip_gen: v7x
topology: tpu7x:2x2x1
jax: 0.10.0
libtpu: 0.0.40
codegen_flags: <defaults>
</compile_context>

<pallas_src>
import functools

import jax
import jax.numpy as jnp
from jax.experimental import pallas as pl
from jax.experimental.pallas import tpu as pltpu


def _mlp_kernel(*refs, first_on_vpu, last_as_reduce):
    """Whole MLP in VMEM, feature-major: h^T = act(W @ h^T + b).

    refs = (xT_ref, w1, b1, w2, b2, ..., wL, bL, oT_ref)
      xT_ref: (in_size, bb) f32, batch on lanes.
      Hidden-layer weights arrive bf16; layer-1 (VPU path) and layer-L
      (reduce path) weights arrive f32. Biases are f32 columns (fan_out, 1).
    """
    xT_ref, oT_ref = refs[0], refs[-1]
    param_refs = refs[1:-1]
    n_layers = len(param_refs) // 2

    h = xT_ref[...]  # (in_size, bb) f32
    for li in range(n_layers):
        w_ref = param_refs[2 * li]
        b_ref = param_refs[2 * li + 1]
        is_first = li == 0
        is_last = li == n_layers - 1

        if is_last and last_as_reduce:
            # out_size == 1: VPU multiply + XLU sublane reduction (no M=1 matmul).
            w = w_ref[...]                                    # (mlp, 1) f32
            h = jnp.sum(h * w, axis=0, keepdims=True) + b_ref[...]   # (1, bb)
        elif is_first and first_on_vpu:
            # Tiny fan_in: unrolled broadcast multiply-adds on the VALU slot.
            w = w_ref[...]                                    # (mlp, in_size) f32
            fan_in = w_ref.shape[1]
            acc = w[:, 0:1] * h[0:1, :]                       # (mlp, bb)
            for f in range(1, fan_in):
                acc = acc + w[:, f : f + 1] * h[f : f + 1, :]
            h = acc + b_ref[...]
        else:
            # Well-shaped hidden layer: bf16 operands on the MXU, f32 accumulate.
            h = (
                jnp.dot(
                    w_ref[...],                               # bf16 (mlp, mlp)
                    h.astype(jnp.bfloat16),
                    preferred_element_type=jnp.float32,
                )
                + b_ref[...]
            )

        if not is_last:
            h = jnp.maximum(h, 0.0)  # ReLU (f32, VPU)

    oT_ref[...] = h.astype(oT_ref.dtype)


def feedforward_network(x, params, *, block_b=8192):
    """MLP forward pass as a single Pallas kernel, tiled over (lane-aligned) batch.

    x:      (B, in_size) float32
    params: list of (W, b) pairs in torch layout, W: (fan_out, fan_in) f32,
            b: (fan_out, 1) f32. Equivalent to nn.Linear: y = x @ W.T + b.T.
    """
    B, in_size = x.shape
    out_size = params[-1][0].shape[0]
    n_layers = len(params)

    first_on_vpu = in_size <= 8      # K too small for the MXU -> VPU broadcast MACs
    last_as_reduce = out_size == 1   # M=1 -> VPU multiply + sublane reduction

    assert block_b % 128 == 0, "batch tile must be lane-aligned (multiple of 128)"
    # Lane-align the batch, then tile-align; zero rows are sliced off afterwards
    # (no cross-row reduction -> safe).
    b_lane = pl.cdiv(B, 128) * 128
    bb = min(block_b, b_lane)
    b_pad = pl.cdiv(b_lane, bb) * bb

    # Pre-transpose once in the wrapper: (in_size, b_pad), batch on the lane axis.
    xT = jnp.pad(x, ((0, b_pad - B), (0, 0))).T

    in_specs = [pl.BlockSpec((in_size, bb), lambda i: (0, i))]
    flat_params = []
    for li, (w, b) in enumerate(params):
        is_first = li == 0
        is_last = li == n_layers - 1
        if is_last and last_as_reduce:
            w_p = w.T.astype(jnp.float32)          # (mlp, 1), stays f32 for the VPU/XLU
        elif is_first and first_on_vpu:
            w_p = w.astype(jnp.float32)            # (mlp, in), stays f32 for the VPU
        else:
            w_p = w.astype(jnp.bfloat16)           # MXU operand: bf16 storage
        b_p = b.astype(jnp.float32)                # biases stay f32
        flat_params += [w_p, b_p]
        # Whole small arrays, constant block index -> stay resident across steps.
        in_specs.append(pl.BlockSpec(w_p.shape, lambda i: (0, 0)))
        in_specs.append(pl.BlockSpec(b_p.shape, lambda i: (0, 0)))
    out_spec = pl.BlockSpec((out_size, bb), lambda i: (0, i))

    kernel = functools.partial(
        _mlp_kernel, first_on_vpu=first_on_vpu, last_as_reduce=last_as_reduce
    )

    oT = pl.pallas_call(
        kernel,
        out_shape=jax.ShapeDtypeStruct((out_size, b_pad), jnp.float32),
        grid=(b_pad // bb,),
        in_specs=in_specs,
        out_specs=out_spec,
        compiler_params=pltpu.CompilerParams(
            dimension_semantics=("parallel",),
        ),
    )(xT, *flat_params)

    # Back to row-major (B, out_size); drop batch padding. (1,N)->(N,1) transpose
    # is a layout no-op.
    return oT[:, :B].T


def init_params(key, in_size, out_size, mlp_size=32, num_layers=3):
    """torch.nn.Linear-style init: W ~ U(-1/sqrt(fan_in), +), torch layout (out, in)."""
    dims = [in_size] + [mlp_size] * num_layers + [out_size]
    params = []
    for fan_in, fan_out in zip(dims[:-1], dims[1:]):
        key, kw, kb = jax.random.split(key, 3)
        bound = 1.0 / jnp.sqrt(jnp.float32(fan_in))
        w = jax.random.uniform(kw, (fan_out, fan_in), jnp.float32, -bound, bound)
        b = jax.random.uniform(kb, (fan_out, 1), jnp.float32, -bound, bound)
        params.append((w, b))
    return params


def _reference(x, params):
    """Pure-JAX f32 reference of the PyTorch forward."""
    h = x
    for i, (w, b) in enumerate(params):
        h = h @ w.T + b.T
        if i < len(params) - 1:
            h = jnp.maximum(h, 0.0)
    return h


if __name__ == "__main__":
    key = jax.random.PRNGKey(0)
    k_params, k_x = jax.random.split(key)

    in_size, out_size, mlp_size, num_layers = 4, 1, 32, 3
    batch = 300  # not a multiple of 128: exercises wrapper-side padding + multi-step grid

    params = init_params(k_params, in_size, out_size, mlp_size, num_layers)
    x = jax.random.normal(k_x, (batch, in_size), jnp.float32)

    # Small tile here so the small test still has a multi-step ("parallel") grid;
    # production default is block_b=8192.
    out = feedforward_network(x, params, block_b=128)
    out = jax.block_until_ready(out)

    ref = _reference(x, params)
    assert out.shape == (batch, out_size)
    # Hidden layers use bf16 MXU operands (f32 accumulate), so tolerance is ~1e-2
    # relative against the f32 reference.
    assert jnp.allclose(out, ref, atol=2e-2, rtol=2e-2), float(
        jnp.max(jnp.abs(out - ref))
    )

    print("KERNEL_OK")
</pallas_src>

<mosaic_0001>
module attributes {stable_mosaic.version = 11 : i64} {
  func.func @_mlp_kernel(%arg0: i32, %arg1: memref<4x128xf32, #tpu.memory_space<vmem>>, %arg2: memref<32x4xf32, #tpu.memory_space<vmem>>, %arg3: memref<32x1xf32, #tpu.memory_space<vmem>>, %arg4: memref<32x32xbf16, #tpu.memory_space<vmem>>, %arg5: memref<32x1xf32, #tpu.memory_space<vmem>>, %arg6: memref<32x32xbf16, #tpu.memory_space<vmem>>, %arg7: memref<32x1xf32, #tpu.memory_space<vmem>>, %arg8: memref<32x1xf32, #tpu.memory_space<vmem>>, %arg9: memref<1x1xf32, #tpu.memory_space<vmem>>, %arg10: memref<1x128xf32, #tpu.memory_space<vmem>>) attributes {dimension_semantics = [#tpu.dimension_semantics<parallel>], iteration_bounds = array<i64: 3>, scalar_prefetch = 0 : i64, scratch_operands = 0 : i64, tpu.core_type = #tpu.core_type<tc>, window_params = [{transform_indices = @transform_0, window_bounds = array<i64: 4, 128>}, {pipeline_mode = #tpu.pipeline_mode<synchronous>, transform_indices = @transform_1, window_bounds = array<i64: 32, 4>}, {pipeline_mode = #tpu.pipeline_mode<synchronous>, transform_indices = @transform_2, window_bounds = array<i64: 32, 1>}, {pipeline_mode = #tpu.pipeline_mode<synchronous>, transform_indices = @transform_3, window_bounds = array<i64: 32, 32>}, {pipeline_mode = #tpu.pipeline_mode<synchronous>, transform_indices = @transform_4, window_bounds = array<i64: 32, 1>}, {pipeline_mode = #tpu.pipeline_mode<synchronous>, transform_indices = @transform_5, window_bounds = array<i64: 32, 32>}, {pipeline_mode = #tpu.pipeline_mode<synchronous>, transform_indices = @transform_6, window_bounds = array<i64: 32, 1>}, {pipeline_mode = #tpu.pipeline_mode<synchronous>, transform_indices = @transform_7, window_bounds = array<i64: 32, 1>}, {pipeline_mode = #tpu.pipeline_mode<synchronous>, transform_indices = @transform_8, window_bounds = array<i64: 1, 1>}, {transform_indices = @transform_9, window_bounds = array<i64: 1, 128>}]} {
    %c0 = arith.constant 0 : index
    %c0_0 = arith.constant 0 : index
    %0 = vector.load %arg1[%c0, %c0_0] : memref<4x128xf32, #tpu.memory_space<vmem>>, vector<4x128xf32>
    %c0_1 = arith.constant 0 : index
    %c0_2 = arith.constant 0 : index
    %1 = vector.load %arg2[%c0_1, %c0_2] : memref<32x4xf32, #tpu.memory_space<vmem>>, vector<32x4xf32>
    %2 = vector.extract_strided_slice %1 {offsets = [0, 0], sizes = [32, 1], strides = [1, 1]} : vector<32x4xf32> to vector<32x1xf32>
    %3 = vector.extract_strided_slice %0 {offsets = [0, 0], sizes = [1, 128], strides = [1, 1]} : vector<4x128xf32> to vector<1x128xf32>
    %4 = vector.broadcast %2 : vector<32x1xf32> to vector<32x128xf32>
    %5 = vector.broadcast %3 : vector<1x128xf32> to vector<32x128xf32>
    %6 = arith.mulf %4, %5 : vector<32x128xf32>
    %7 = vector.extract_strided_slice %1 {offsets = [0, 1], sizes = [32, 1], strides = [1, 1]} : vector<32x4xf32> to vector<32x1xf32>
    %8 = vector.extract_strided_slice %0 {offsets = [1, 0], sizes = [1, 128], strides = [1, 1]} : vector<4x128xf32> to vector<1x128xf32>
    %9 = vector.broadcast %7 : vector<32x1xf32> to vector<32x128xf32>
    %10 = vector.broadcast %8 : vector<1x128xf32> to vector<32x128xf32>
    %11 = arith.mulf %9, %10 : vector<32x128xf32>
    %12 = arith.addf %6, %11 : vector<32x128xf32>
    %13 = vector.extract_strided_slice %1 {offsets = [0, 2], sizes = [32, 1], strides = [1, 1]} : vector<32x4xf32> to vector<32x1xf32>
    %14 = vector.extract_strided_slice %0 {offsets = [2, 0], sizes = [1, 128], strides = [1, 1]} : vector<4x128xf32> to vector<1x128xf32>
    %15 = vector.broadcast %13 : vector<32x1xf32> to vector<32x128xf32>
    %16 = vector.broadcast %14 : vector<1x128xf32> to vector<32x128xf32>
    %17 = arith.mulf %15, %16 : vector<32x128xf32>
    %18 = arith.addf %12, %17 : vector<32x128xf32>
    %19 = vector.extract_strided_slice %1 {offsets = [0, 3], sizes = [32, 1], strides = [1, 1]} : vector<32x4xf32> to vector<32x1xf32>
    %20 = vector.extract_strided_slice %0 {offsets = [3, 0], sizes = [1, 128], strides = [1, 1]} : vector<4x128xf32> to vector<1x128xf32>
    %21 = vector.broadcast %19 : vector<32x1xf32> to vector<32x128xf32>
    %22 = vector.broadcast %20 : vector<1x128xf32> to vector<32x128xf32>
    %23 = arith.mulf %21, %22 : vector<32x128xf32>
    %24 = arith.addf %18, %23 : vector<32x128xf32>
    %c0_3 = arith.constant 0 : index
    %c0_4 = arith.constant 0 : index
    %25 = vector.load %arg3[%c0_3, %c0_4] : memref<32x1xf32, #tpu.memory_space<vmem>>, vector<32x1xf32>
    %26 = vector.broadcast %25 : vector<32x1xf32> to vector<32x128xf32>
    %27 = arith.addf %24, %26 : vector<32x128xf32>
    %cst = arith.constant 0.000000e+00 : f32
    %28 = vector.broadcast %cst : f32 to vector<32x128xf32>
    %29 = arith.maximumf %27, %28 : vector<32x128xf32>
    %c0_5 = arith.constant 0 : index
    %c0_6 = arith.constant 0 : index
    %30 = vector.load %arg4[%c0_5, %c0_6] : memref<32x32xbf16, #tpu.memory_space<vmem>>, vector<32x32xbf16>
    %31 = arith.truncf %29 : vector<32x128xf32> to vector<32x128xbf16>
    %cst_7 = arith.constant dense<0.000000e+00> : vector<32x128xf32>
    %32 = tpu.matmul %30, %31, %cst_7 {dimension_numbers = #tpu.dot_dimension_numbers<[1], [0], [0], [1], [0, 0, 1, 1], [], []>} : vector<32x32xbf16>, vector<32x128xbf16>, vector<32x128xf32> -> vector<32x128xf32>
    %c0_8 = arith.constant 0 : index
    %c0_9 = arith.constant 0 : index
    %33 = vector.load %arg5[%c0_8, %c0_9] : memref<32x1xf32, #tpu.memory_space<vmem>>, vector<32x1xf32>
    %34 = vector.broadcast %33 : vector<32x1xf32> to vector<32x128xf32>
    %35 = arith.addf %32, %34 : vector<32x128xf32>
    %cst_10 = arith.constant 0.000000e+00 : f32
    %36 = vector.broadcast %cst_10 : f32 to vector<32x128xf32>
    %37 = arith.maximumf %35, %36 : vector<32x128xf32>
    %c0_11 = arith.constant 0 : index
    %c0_12 = arith.constant 0 : index
    %38 = vector.load %arg6[%c0_11, %c0_12] : memref<32x32xbf16, #tpu.memory_space<vmem>>, vector<32x32xbf16>
    %39 = arith.truncf %37 : vector<32x128xf32> to vector<32x128xbf16>
    %cst_13 = arith.constant dense<0.000000e+00> : vector<32x128xf32>
    %40 = tpu.matmul %38, %39, %cst_13 {dimension_numbers = #tpu.dot_dimension_numbers<[1], [0], [0], [1], [0, 0, 1, 1], [], []>} : vector<32x32xbf16>, vector<32x128xbf16>, vector<32x128xf32> -> vector<32x128xf32>
    %c0_14 = arith.constant 0 : index
    %c0_15 = arith.constant 0 : index
    %41 = vector.load %arg7[%c0_14, %c0_15] : memref<32x1xf32, #tpu.memory_space<vmem>>, vector<32x1xf32>
    %42 = vector.broadcast %41 : vector<32x1xf32> to vector<32x128xf32>
    %43 = arith.addf %40, %42 : vector<32x128xf32>
    %cst_16 = arith.constant 0.000000e+00 : f32
    %44 = vector.broadcast %cst_16 : f32 to vector<32x128xf32>
    %45 = arith.maximumf %43, %44 : vector<32x128xf32>
    %c0_17 = arith.constant 0 : index
    %c0_18 = arith.constant 0 : index
    %46 = vector.load %arg8[%c0_17, %c0_18] : memref<32x1xf32, #tpu.memory_space<vmem>>, vector<32x1xf32>
    %47 = vector.broadcast %46 : vector<32x1xf32> to vector<32x128xf32>
    %48 = arith.mulf %45, %47 : vector<32x128xf32>
    %cst_19 = arith.constant dense<0.000000e+00> : vector<128xf32>
    %49 = vector.multi_reduction <add>, %48, %cst_19 [0] : vector<32x128xf32> to vector<128xf32>
    %50 = vector.shape_cast %49 : vector<128xf32> to vector<1x128xf32>
    %c0_20 = arith.constant 0 : index
    %c0_21 = arith.constant 0 : index
    %51 = vector.load %arg9[%c0_20, %c0_21] : memref<1x1xf32, #tpu.memory_space<vmem>>, vector<1x1xf32>
    %52 = vector.broadcast %51 : vector<1x1xf32> to vector<1x128xf32>
    %53 = arith.addf %50, %52 : vector<1x128xf32>
    %c0_22 = arith.constant 0 : index
    %c0_23 = arith.constant 0 : index
    %54 = vector.load %arg10[%c0_22, %c0_23] : memref<1x128xf32, #tpu.memory_space<vmem>>, vector<1x128xf32>
    tpu.vector_store %arg10[%c0_22, %c0_23], %53 {strides = array<i32>} : memref<1x128xf32, #tpu.memory_space<vmem>>, vector<1x128xf32>,
    return
  }
  func.func @transform_0(%arg0: i32) -> (i32, i32) {
    %c0_i32 = arith.constant 0 : i32
    %c0_i32_0 = arith.constant 0 : i32
    return %c0_i32, %arg0 : i32, i32
  }
  func.func @transform_1(%arg0: i32) -> (i32, i32) {
    %c0_i32 = arith.constant 0 : i32
    %c0_i32_0 = arith.constant 0 : i32
    %c0_i32_1 = arith.constant 0 : i32
    return %c0_i32, %c0_i32_0 : i32, i32
  }
  func.func @transform_2(%arg0: i32) -> (i32, i32) {
    %c0_i32 = arith.constant 0 : i32
    %c0_i32_0 = arith.constant 0 : i32
    %c0_i32_1 = arith.constant 0 : i32
    return %c0_i32, %c0_i32_0 : i32, i32
  }
  func.func @transform_3(%arg0: i32) -> (i32, i32) {
    %c0_i32 = arith.constant 0 : i32
    %c0_i32_0 = arith.constant 0 : i32
    %c0_i32_1 = arith.constant 0 : i32
    return %c0_i32, %c0_i32_0 : i32, i32
  }
  func.func @transform_4(%arg0: i32) -> (i32, i32) {
    %c0_i32 = arith.constant 0 : i32
    %c0_i32_0 = arith.constant 0 : i32
    %c0_i32_1 = arith.constant 0 : i32
    return %c0_i32, %c0_i32_0 : i32, i32
  }
  func.func @transform_5(%arg0: i32) -> (i32, i32) {
    %c0_i32 = arith.constant 0 : i32
    %c0_i32_0 = arith.constant 0 : i32
    %c0_i32_1 = arith.constant 0 : i32
    return %c0_i32, %c0_i32_0 : i32, i32
  }
  func.func @transform_6(%arg0: i32) -> (i32, i32) {
    %c0_i32 = arith.constant 0 : i32
    %c0_i32_0 = arith.constant 0 : i32
    %c0_i32_1 = arith.constant 0 : i32
    return %c0_i32, %c0_i32_0 : i32, i32
  }
  func.func @transform_7(%arg0: i32) -> (i32, i32) {
    %c0_i32 = arith.constant 0 : i32
    %c0_i32_0 = arith.constant 0 : i32
    %c0_i32_1 = arith.constant 0 : i32
    return %c0_i32, %c0_i32_0 : i32, i32
  }
  func.func @transform_8(%arg0: i32) -> (i32, i32) {
    %c0_i32 = arith.constant 0 : i32
    %c0_i32_0 = arith.constant 0 : i32
    %c0_i32_1 = arith.constant 0 : i32
    return %c0_i32, %c0_i32_0 : i32, i32
  }
  func.func @transform_9(%arg0: i32) -> (i32, i32) {
    %c0_i32 = arith.constant 0 : i32
    %c0_i32_0 = arith.constant 0 : i32
    return %c0_i32, %arg0 : i32, i32
  }
}

</mosaic_0001>

<bundles_post_ra>
// kernel: tpu_custom_call.1
= control target key start
LH: loop header
LB: loop body
LE: loop exit
PB: predicated region body
PF: predicated region fallthrough
CT: control target
= control target key end

     0   :  { %s1201_s0 = inlined_call_operand.vmem [shape: f32[4,384], index: 0, kind: input, shape index: {}]   ;;  %s1202_s1 = inlined_call_operand.vmem [shape: f32[32,4], index: 1, kind: input, shape index: {}]   ;;  %s1203_s2 = inlined_call_operand.vmem [shape: f32[32,1], index: 2, kind: input, shape index: {}]   ;;  %s1204_s3 = inlined_call_operand.vmem [shape: bf16[32,32], index: 3, kind: input, shape index: {}]   ;;  %s1205_s4 = inlined_call_operand.vmem [shape: f32[32,1], index: 4, kind: input, shape index: {}]   ;;  %s1206_s5 = inlined_call_operand.vmem [shape: bf16[32,32], index: 5, kind: input, shape index: {}]   ;;  %s1207_s6 = inlined_call_operand.vmem [shape: f32[32,1], index: 6, kind: input, shape index: {}]   ;;  %s1208_s7 = inlined_call_operand.vmem [shape: f32[32,1], index: 7, kind: input, shape index: {}]   ;;  %s1209_s8 = inlined_call_operand.<no memory space> [shape: f32[1,1], index: 8, kind: input, shape index: {}]   ;;  %s1210_s9 = inlined_call_operand.hbm [shape: f32[1,384], index: 9, kind: output, shape index: {}]  }
   0x1   :  { %v14_v0 = vstv %s1209_s8 }
   0x2   :  { %15 = vst [vmem:[#allocation2] sm:$0x1] %v14_v0 }
   0x3   :  { %16 = vsyncpa [#allocation4], 0 }
   0x4   :  { %18 = vsyncpa [#allocation4 + $0x1], 0  ;;  %s1015_s11 = smov 0   ;;  %s1017_s12 = smov 0  }
   0x5   :  { %s1019_s13 = smov 0   ;;  %s1021_s14 = smov 0  }
   0x6 LB: > { %s1036_s8 = sadd.s32 4294967295, %s955_s14   ;;  %s795_s15 = sadd.s32 4294967294, %s955_s14   ;;  %s955_s14 = sphi %s1021_s14, %s1216_s14   ;;  %s951_s13 = sphi %s1019_s13, %s1215_s13   ;;  %s947_s12 = sphi %s1017_s12, %s1214_s12   ;;  %s943_s11 = sphi %s1015_s11, %s1213_s11  }
   0x7   : > { %s1040_s16 = sadd.s32 1, %s955_s14   ;;  %s225_s17 = sadd.s32 1, %s951_s13 }
   0x8   : > { %s222_s18 = ssub.s32 %s955_s14, %s1040_s16  ;;  %p235_p0 = scmp.ne.s32.totalorder %s951_s13, %s947_s12 }
   0x9   : > { %p223_p1 = scmp.eq.s32.totalorder %s222_s18, 0  ;;  %p236_p2 = scmp.eq.s32.totalorder %s1036_s8, 2 }
   0xa   : > { %p241_p3 = scmp.ne.s32.totalorder %s947_s12, %s943_s11  ;;  %p242_p4 = scmp.eq.s32.totalorder %s795_s15, 2 }
   0xb   : > { %s1051_s19 = scalar_select %p223_p1, %s951_s13, %s225_s17  }
   0xc   : > { %p1053_p5 = por %p236_p2, %p235_p0  ;;  %p1057_p6 = por %p242_p4, %p241_p3 }
   0xd   : > { %p798_p7 = scmp.ge.s32.totalorder %s955_s14, 1  ;;  %p291_p8 = scmp.lt.s32.totalorder %s955_s14, 4 }
   0xf   : > { %p292_p9 = pnand %p798_p7, %p291_p8 }
  0x10   : > { %v331_v1 = vld [vmem:[%s1202_s1] sm:$0xff] (!%p292_p9)  ;;  %v957_v2 = vmov (!%p292_p9), 3   ;;  %v958_v3 = vmov (!%p292_p9), 1   ;;  %v332_v4 = vld [vmem:[%s1202_s1 + $0x8] sm:$0xff] (!%p292_p9)  ;;  %v959_v5 = vmov (!%p292_p9), 2   ;;  %v334_v6 = vld [vmem:[%s1202_s1 + $0x18] sm:$0xff] (!%p292_p9)  ;;  %v355_v34 = vlaneseq (!%p292_p9) }
  0x11   : > { %295 = sbr.rel (%p292_p9) target bundleno = 691 (0x2b3), region = 56  ;;  %882 = vset.pattern.permute.xlu0 (!%p292_p9), %v957_v2  ;;  %878 = vset.pattern.permute.xlu1 (!%p292_p9), %v958_v3  ;;  %v333_v7 = vld [vmem:[%s1202_s1 + $0x10] sm:$0xff] (!%p292_p9)  ;;  %v960_v8 = vmov (!%p292_p9), 0   ;;  %v447_v9 = vld [vmem:[%s1203_s2] sm:$0xff] (!%p292_p9)  ;;  %v450_v10 = vld [vmem:[%s1203_s2 + $0x18] sm:$0xff] (!%p292_p9)  ;;  %vm519_vm0 = vcmask (!%p292_p9), 261120  }
  0x12   : > { %420 = vperm.xlu0 (!%p292_p9), %882, %v331_v1   ;;  %364 = vperm.xlu1 (!%p292_p9), %878, %v331_v1   ;;  %v486_v11 = vld [vmem:[%s1205_s4 + $0x8] sm:$0xff] (!%p292_p9)  ;;  %v488_v12 = vld [vmem:[%s1205_s4 + $0x18] sm:$0xff] (!%p292_p9)  ;;  %v449_v17 = vld [vmem:[%s1203_s2 + $0x10] sm:$0xff] (!%p292_p9)  ;;  %p325_p10 = scmp.lt.s32.totalorder (!%p292_p9), %s1036_s8, 2  ;;  %v1129_v37 = vshrl.u32 (!%p292_p9), %v355_v34, 7  ;;  %s323_s23 = sand.u32 (!%p292_p9), 1, %s947_s12  }
  0x13   : > { %v586_v13 = vld [vmem:[%s1207_s6 + $0x8] sm:$0xff] (!%p292_p9)  ;;  %v588_v14 = vld [vmem:[%s1207_s6 + $0x18] sm:$0xff] (!%p292_p9)  ;;  %v485_v19 = vld [vmem:[%s1205_s4] sm:$0xff] (!%p292_p9)  ;;  %s808_s24 = sshll.u32 (!%p292_p9), %s1036_s8, 4  ;;  %s728_s30 = scalar_lea.sflag (!%p292_p9), [#allocation4], %s323_s23 }
  0x14   : > { %v448_v15 = vld [vmem:[%s1203_s2 + $0x8] sm:$0xff] (!%p292_p9)  ;;  %v681_v18 = vld [vmem:[%s1208_s7 + $0x18] sm:$0xff] (!%p292_p9)  ;;  %v487_v20 = vld [vmem:[%s1205_s4 + $0x10] sm:$0xff] (!%p292_p9)  ;;  %v357_v39 = vsub.s32 (!%p292_p9), 0, %v1129_v37  ;;  %v381_v40 = vsub.s32 (!%p292_p9), 1, %v1129_v37  ;;  %v409_v45 = vsub.s32 (!%p292_p9), 2, %v1129_v37 }
  0x15   : > { %v679_v16 = vld [vmem:[%s1208_s7 + $0x8] sm:$0xff] (!%p292_p9)  ;;  %v889_v21 = vld [vmem:[%s1204_s3] sm:$0xff] (!%p292_p9)   ;;  %v587_v23 = vld [vmem:[%s1207_s6 + $0x10] sm:$0xff] (!%p292_p9)  ;;  %v437_v47 = vsub.s32 (!%p292_p9), 3, %v1129_v37  ;;  %s961_s10 = smov (!%p292_p9), [#allocation3]  }
  0x16   : > { %883 = vset.pattern.permute.xlu0 (!%p292_p9), %v959_v5  ;;  %368 = vperm.xlu1 (!%p292_p9), %878, %v332_v4   ;;  %v585_v22 = vld [vmem:[%s1207_s6] sm:$0xff] (!%p292_p9)  ;;  %v680_v25 = vld [vmem:[%s1208_s7 + $0x10] sm:$0xff] (!%p292_p9)  ;;  %s897_s15 = sshll.u32 (!%p292_p9), %s961_s10, 4  ;;  %s898_s15 = int_to_ptr.vmem [resolvable:$false] %s897_s15 }
  0x17   : > { %392 = vperm.xlu0 (!%p292_p9), %883, %v331_v1   ;;  %823 = vmatprep.mubr.msk.bf16.mxu0 (!%p292_p9), %vm519_vm0, %v889_v21  ;;  %v678_v24 = vld [vmem:[%s1208_s7] sm:$0xff] (!%p292_p9)  ;;  %s899_s17 = scalar_lea.vmem (!%p292_p9), %s898_s15, 32 }
  0x18   : > { %v715_v26 = vld [vmem:[#allocation2] sm:$0x1]  ;;  %s326_s25 = scalar_select %p325_p10, %s1036_s8, 2 }
  0x1a   : > { %879 = vset.pattern.permute.xlu1 %v959_v5  ;;  %s799_s26 = sshll.u32 %s326_s25, 2  ;;  %s324_s25 = scalar_lea.vmem [#allocation3], %s323_s23 }
  0x1b   : > { %404 = vperm.xlu0 %883, %v334_v6   ;;  %396 = vperm.xlu1 %879, %v332_v4   ;;  %s328_s29 = scalar_lea.vmem %s1201_s0, %s799_s26  ;;  %s740_s26 = sshll.u32 %s324_s25, 4  ;;  %s1161_s26 = int_to_ptr.vmem [resolvable:$true] %s740_s26 }
  0x1c   : > { %v330_v41 = vld [vmem:[%s328_s29] sm:$0xf]  ;;  %s1159_s29 = scalar_lea.hbm %s1210_s9, %s808_s24  ;;  %s893_s8 = scalar_lea.vmem %s1161_s26, 16 }
  0x1d   : > { %v358_v43 = vrot.slane %v330_v41, %v357_v39  ;;  %v382_v46 = vrot.slane %v330_v41, %v381_v40  ;;  %v410_v49 = vrot.slane %v330_v41, %v409_v45  ;;  %v438_v53 = vrot.slane %v330_v41, %v437_v47  ;;  %p894_p11 = scmp.ne.s32.totalorder %s1161_s26, %s893_s8  ;;  %p900_p0 = scmp.lt.s32.totalorder %s1161_s26, %s898_s15 }
  0x1e   : > { %p901_p1 = scmp.lt.s32.totalorder %s899_s17, %s893_s8 }
  0x1f   : > { %886 = vset.pattern.permute.xlu0 %v960_v8  ;;  %880 = vset.pattern.permute.xlu1 %v960_v8  ;;  %p895_p12 = pnand %p894_p11, %p1053_p5 }
  0x20   : > { %337 = vperm.xlu0 %886, %v331_v1   ;;  %347 = vperm.xlu1 %880, %v333_v7   ;;  %p902_p2 = por %p901_p1, %p900_p0 }
  0x21   : > { %p896_p13 = pneg %p895_p12 }
  0x23   : > { %p903_p3 = pnand %p902_p2, %p896_p13 }
  0x24   : > { %342 = vperm.xlu0 %886, %v332_v4   ;;  %881 = vset.pattern.permute.xlu1 %v958_v3 }
  0x25   : > { %372 = vperm.xlu1 %881, %v333_v7  }
  0x28   : > { %352 = vperm.xlu0 %886, %v334_v6  }
  0x29   : > { %376 = vperm.xlu1 %881, %v334_v6  }
  0x2c   : > { %453 = vperm.xlu0 %886, %v447_v9  }
  0x2d   : > { %884 = vset.pattern.permute.xlu1 %v957_v2 }
  0x2e   : > { %424 = vperm.xlu1 %884, %v332_v4  }
  0x30   : > { %468 = vperm.xlu0 %886, %v450_v10  }
  0x32   : > { %885 = vset.pattern.permute.xlu1 %v959_v5 }
  0x33   : > { %400 = vperm.xlu1 %885, %v333_v7  }
  0x34   : > { %496 = vperm.xlu0 %886, %v486_v11  }
  0x37   : > { %887 = vset.pattern.permute.xlu1 %v957_v2 }
  0x38   : > { %506 = vperm.xlu0 %886, %v488_v12   ;;  %428 = vperm.xlu1 %887, %v333_v7  }
  0x3c   : > { %596 = vperm.xlu0 %886, %v586_v13   ;;  %432 = vperm.xlu1 %887, %v334_v6  }
  0x40   : > { %606 = vperm.xlu0 %886, %v588_v14   ;;  %888 = vset.pattern.permute.xlu1 %v960_v8 }
  0x41   : > { %458 = vperm.xlu1 %888, %v448_v15  }
  0x44   : > { %689 = vperm.xlu0 %886, %v679_v16  }
  0x45   : > { %463 = vperm.xlu1 %888, %v449_v17  }
  0x48   : > { %699 = vperm.xlu0 %886, %v681_v18  }
  0x49   : > { %491 = vperm.xlu1 %888, %v485_v19  }
  0x4d   : > { %501 = vperm.xlu1 %888, %v487_v20  }
  0x51   : > { %591 = vperm.xlu1 %888, %v585_v22  }
  0x55   : > { %601 = vperm.xlu1 %888, %v587_v23  }
  0x59   : > { %684 = vperm.xlu1 %888, %v678_v24  }
  0x5d   : > { %694 = vperm.xlu1 %888, %v680_v25  }
  0x61   : > { %718 = vperm.xlu1 %888, %v715_v26  }
  0x91   : > { %v365_v27 = vpop.permute.xlu1 %364  ;;  %v421_v28 = vpop.permute.xlu0 %420 }
  0x92   : > { %v383_v52 = vmul.f32 %v382_v46, %v365_v27  ;;  %v439_v61 = vmul.f32 %v438_v53, %v421_v28 }
  0x95   : > { %v369_v29 = vpop.permute.xlu1 %368 }
  0x96   : > { %v393_v30 = vpop.permute.xlu0 %392  ;;  %v384_v59 = vmul.f32 %v382_v46, %v369_v29 }
  0x97   : > { %v411_v54 = vmul.f32 %v410_v49, %v393_v30 }
  0x9a   : > { %v397_v31 = vpop.permute.xlu1 %396  ;;  %v405_v33 = vpop.permute.xlu0 %404 }
  0x9b   : > { %v414_v62 = vmul.f32 %v410_v49, %v405_v33  ;;  %v412_v3 = vmul.f32 %v410_v49, %v397_v31  ;;  %v891_v33 = vld [vmem:[%s1206_s5] sm:$0xff]  }
  0x9c   : > { %831 = vmatprep.mubr.msk.bf16.mxu1 %vm519_vm0, %v891_v33 }
  0x9f   : > { %v348_v32 = vpop.permute.xlu1 %347  ;;  %v338_v36 = vpop.permute.xlu0 %337 }
  0xa0   : > { %v359_v48 = vmul.f32 %v358_v43, %v338_v36  ;;  %v361_v6 = vmul.f32 %v358_v43, %v348_v32  ;;  %v890_v32 = vld [vmem:[%s1204_s3 + $0x8] sm:$0xff]  }
  0xa2   : > { %v387_v55 = vadd.f32 %v383_v52, %v359_v48 }
  0xa3   : > { %v343_v42 = vpop.permute.xlu0 %342 }
  0xa4   : > { %v373_v35 = vpop.permute.xlu1 %372  ;;  %v360_v56 = vmul.f32 %v358_v43, %v343_v42  ;;  %v415_v1 = vadd.f32 %v411_v54, %v387_v55  ;;  %v892_v54 = vld [vmem:[%s1206_s5 + $0x8] sm:$0xff]  }
  0xa5   : > { %v385_v2 = vmul.f32 %v382_v46, %v373_v35 }
  0xa6   : > { %v388_v63 = vadd.f32 %v384_v59, %v360_v56  ;;  %v443_v9 = vadd.f32 %v439_v61, %v415_v1 }
  0xa7   : > { %v353_v50 = vpop.permute.xlu0 %352  ;;  %v389_v13 = vadd.f32 %v385_v2, %v361_v6 }
  0xa8   : > { %v377_v38 = vpop.permute.xlu1 %376  ;;  %v362_v57 = vmul.f32 %v358_v43, %v353_v50  ;;  %v416_v12 = vadd.f32 %v412_v3, %v388_v63 }
  0xa9   : > { %v386_v58 = vmul.f32 %v382_v46, %v377_v38 }
  0xab   : > { %v390_v0 = vadd.f32 %v386_v58, %v362_v57  ;;  %v454_v7 = vpop.permute.xlu0 %453 }
  0xac   : > { %v471_v14 = vadd.f32 %v454_v7, %v443_v9 }
  0xad   : > { %v425_v44 = vpop.permute.xlu1 %424  ;;  %v418_v11 = vadd.f32 %v414_v62, %v390_v0 }
  0xae   : > { %v440_v4 = vmul.f32 %v438_v53, %v425_v44  ;;  %v475_v22 = vmax.f32 %v471_v14, 0.0 }
  0xaf   : > { %v469_v21 = vpop.permute.xlu0 %468 }
  0xb0   : > { %v444_v17 = vadd.f32 %v440_v4, %v416_v12 }
  0xb2   : > { %v401_v51 = vpop.permute.xlu1 %400 }
  0xb3   : > { %v413_v10 = vmul.f32 %v410_v49, %v401_v51  ;;  %v497_v35 = vpop.permute.xlu0 %496 }
  0xb5   : > { %v417_v19 = vadd.f32 %v413_v10, %v389_v13 }
  0xb7   : > { %v429_v60 = vpop.permute.xlu1 %428  ;;  %v507_v42 = vpop.permute.xlu0 %506 }
  0xb8   : > { %v441_v15 = vmul.f32 %v438_v53, %v429_v60 }
  0xba   : > { %v445_v25 = vadd.f32 %v441_v15, %v417_v19 }
  0xbb   : > { %v433_v5 = vpop.permute.xlu1 %432  ;;  %v597_v56 = vpop.permute.xlu0 %596 }
  0xbc   : > { %v442_v8 = vmul.f32 %v438_v53, %v433_v5 }
  0xbe   : > { %v446_v16 = vadd.f32 %v442_v8, %v418_v11 }
  0xbf   : > { %v607_v58 = vpop.permute.xlu0 %606 }
  0xc0   : > { %v459_v18 = vpop.permute.xlu1 %458  ;;  %v474_v23 = vadd.f32 %v469_v21, %v446_v16 }
  0xc1   : > { %v472_v20 = vadd.f32 %v459_v18, %v444_v17 }
  0xc2   : > { %v478_v30 = vmax.f32 %v474_v23, 0.0 }
  0xc3   : > { %v476_v24 = vmax.f32 %v472_v20, 0.0  ;;  %v690_v5 = vpop.permute.xlu0 %689 }
  0xc4   : > { %v464_v26 = vpop.permute.xlu1 %463 }
  0xc5   : > { %v473_v27 = vadd.f32 %v464_v26, %v445_v25  ;;  %v483_v28 = vpack.c.bf16 %v476_v24, %v475_v22 }
  0xc7   : > { %v477_v29 = vmax.f32 %v473_v27, 0.0  ;;  %819 = vmatprep.subr.bf16.mxu0 %v483_v28  ;;  %v700_v14 = vpop.permute.xlu0 %699 }
  0xc8   : > { %820 = vmatpush3.bf16.msra.mxu0 %v483_v28  ;;  %v492_v34 = vpop.permute.xlu1 %491 }
  0xc9   : > { %v484_v31 = vpack.c.bf16 %v478_v30, %v477_v29 }
  0xcb   : > { %821 = vmatprep.subr.bf16.mxu0 %v484_v31 }
  0xcc   : > { %822 = vmatpush3.bf16.msra.mxu0 %v484_v31  ;;  %v502_v36 = vpop.permute.xlu1 %501 }
  0xcf   : > { %824 = vmatmul.mubr.msk.bf16.vlgmr.msra.gmra.mrb[0].mxu0 %vm519_vm0, %v890_v32 }
  0xd0   : > { %v592_v55 = vpop.permute.xlu1 %591 }
  0xd4   : > { %v602_v57 = vpop.permute.xlu1 %601 }
  0xd8   : > { %v685_v0 = vpop.permute.xlu1 %684 }
  0xdc   : > { %v695_v11 = vpop.permute.xlu1 %694 }
  0xe0   : > { %v719_v22 = vpop.permute.xlu1 %718 }
  0xe1   : > { %v724_v24 = vrot.slane %v719_v22, %v357_v39 }
 0x1a2   : > { %v825_v38 = vpop.f32.mrb[0].mxu0 }
 0x1a3   : > { %v569_v40 = vadd.f32 %v825_v38, %v502_v36  ;;  %v560_v41 = vpop.f32.mrb[1].mxu0 }
 0x1a4   : > { %v561_v43 = vadd.f32 %v560_v41, %v492_v34  ;;  %v826_v44 = vpop.f32.mrb[2].mxu0 }
 0x1a5   : > { %v572_v45 = vadd.f32 %v826_v44, %v507_v42  ;;  %v563_v46 = vpop.f32.mrb[3].mxu0  ;;  %v577_v48 = vmax.f32 %v569_v40, 0.0 }
 0x1a6   : > { %v564_v47 = vadd.f32 %v563_v46, %v497_v35  ;;  %v575_v50 = vmax.f32 %v561_v43, 0.0 }
 0x1a7   : > { %v578_v49 = vmax.f32 %v572_v45, 0.0 }
 0x1a8   : > { %v576_v51 = vmax.f32 %v564_v47, 0.0 }
 0x1a9   : > { %v584_v52 = vpack.c.bf16 %v578_v49, %v577_v48 }
 0x1aa   : > { %v583_v53 = vpack.c.bf16 %v576_v51, %v575_v50 }
 0x1ac   : > { %827 = vmatprep.subr.bf16.mxu1 %v583_v53 }
 0x1ad   : > { %828 = vmatpush3.bf16.msra.mxu1 %v583_v53 }
 0x1ae   : > { %829 = vmatprep.subr.bf16.mxu1 %v584_v52 }
 0x1b1   : > { %830 = vmatpush3.bf16.msra.mxu1 %v584_v52 }
 0x1b4   : > { %832 = vmatmul.mubr.msk.bf16.vlgmr.msra.gmra.mrb[0].mxu1 %vm519_vm0, %v892_v54 }
 0x287   : > { %v833_v59 = vpop.f32.mrb[0].mxu1 }
 0x288   : > { %v659_v60 = vpop.f32.mrb[1].mxu1  ;;  %v668_v61 = vadd.f32 %v833_v59, %v602_v57 }
 0x289   : > { %v660_v62 = vadd.f32 %v659_v60, %v592_v55  ;;  %v834_v63 = vpop.f32.mrb[2].mxu1 }
 0x28a   : > { %v662_v1 = vpop.f32.mrb[3].mxu1  ;;  %v671_v3 = vadd.f32 %v834_v63, %v607_v58  ;;  %v676_v6 = vmax.f32 %v668_v61, 0.0 }
 0x28b   : > { %v674_v2 = vmax.f32 %v660_v62, 0.0  ;;  %v663_v4 = vadd.f32 %v662_v1, %v597_v56 }
 0x28c   : > { %v677_v9 = vmax.f32 %v671_v3, 0.0  ;;  %v704_v12 = vmul.f32 %v695_v11, %v676_v6 }
 0x28d   : > { %v675_v7 = vmax.f32 %v663_v4, 0.0  ;;  %v702_v8 = vmul.f32 %v685_v0, %v674_v2 }
 0x28e   : > { %v705_v15 = vmul.f32 %v700_v14, %v677_v9 }
 0x28f   : > { %v703_v10 = vmul.f32 %v690_v5, %v675_v7 }
 0x291   : > { %v706_v13 = vadd.f32 %v703_v10, %v702_v8 }
 0x293   : > { %v707_v16 = vadd.f32 %v706_v13, %v704_v12 }
 0x295   : > { %v708_v17 = vadd.f32 %v707_v16, %v705_v15 }
 0x297   : > { %v709_v18 = vrot.slane %v708_v17, 4 }
 0x299   : > { %v710_v19 = vadd.f32 %v709_v18, %v708_v17 }
 0x29b   : > { %v711_v20 = vrot.slane %v710_v19, 2 }
 0x29d   : > { %v712_v21 = vadd.f32 %v711_v20, %v710_v19 }
 0x29f   : > { %v713_v23 = vrot.slane %v712_v21, 1 }
 0x2a1   : > { %v714_v25 = vadd.f32 %v713_v23, %v712_v21 }
 0x2a3   : > { %v725_v26 = vadd.f32 %v724_v24, %v714_v25 }
 0x2a5   : > { %726 = vst [vmem:[%s324_s25] sm:$0x1] %v725_v26 }
 0x2a6   : > { %906 = shalt.err (!%p903_p3)
}
 0x2a7   : > { %s907_s18 = scalar_lea.hbm %s1159_s29, 16  ;;  %s911_s24 = scalar_lea.hbm %s1210_s9, 48 }
 0x2a8   : > { %p908_p4 = scmp.ne.s32.totalorder %s1159_s29, %s907_s18  ;;  %p912_p9 = scmp.lt.u32.totalorder %s1159_s29, %s1210_s9 }
 0x2a9   : > { %p913_p10 = scmp.lt.u32.totalorder %s911_s24, %s907_s18  ;;  %p915_p12 = scmp.lt.u32.totalorder %s907_s18, %s1159_s29 }
 0x2aa   : > { %p909_p7 = pnand %p908_p4, %p1053_p5 }
 0x2ab   : > { %p914_p11 = por %p913_p10, %p912_p9 }
 0x2ac   : > { %p910_p8 = pneg %p909_p7 }
 0x2ad   : > { %p916_p13 = por %p915_p12, %p914_p11 }
 0x2af   : > { %p917_p0 = pnand %p916_p13, %p910_p8 }
 0x2b1   : > { %920 = shalt.err (!%p917_p0)
}
 0x2b2   : > { %835 = dma.vmem_to_hbm [thread:$0]  (%p1053_p5), %s1161_s26, 16, %s1159_s29, %s728_s30  }
 0x2b3 PF: > { %p841_p1 = scmp.ge.s32.totalorder %s955_s14, 2  ;;  %s752_s28 = sand.u32 1, %s943_s11  }
 0x2b4   : > { %s753_s8 = scalar_lea.sflag [#allocation4], %s752_s28 }
 0x2b5   : > { %p838_p2 = pnand %p841_p1, %p1057_p6 }
 0x2b7   : > { %938 = dma.done.wait (!%p838_p2), %s753_s8, 16  }
 0x2b8   : > { %940 = vsyncadd (!%p838_p2), %s753_s8, 4294967280  ;;  %p21_p3 = scmp.ge.s32.totalorder %s1040_s16, 5   ;;  %s1213_s11 = smov %s947_s12 }
 0x2b9   : > { %s1214_s12 = smov %s951_s13  ;;  %s1215_s13 = smov %s1051_s19 }
 0x2ba   : > { %s1216_s14 = smov %s1040_s16  ;;  %23 = sbr.rel (!%p21_p3) target bundleno = 6 (0x6), region = 91 }
 0x2c1   :  { %757 = vsyncpa [#allocation4], 1 }
 0x2c2   :  { %759 = vsyncpa [#allocation4 + $0x1], 1 }

</bundles_post_ra>
